<compile_context>
chip_gen: v6e
topology: v6e:2x2x1
jax: 0.10.0
libtpu: 0.0.40
codegen_flags: <defaults>
</compile_context>

<pallas_src>
import functools

import jax
import jax.numpy as jnp
import numpy as np
from jax.experimental import pallas as pl
from jax.experimental.pallas import tpu as pltpu


# ----------------------------- small helpers --------------------------------

def _round_up(x, m):
    return ((x + m - 1) // m) * m


def _pad2d(x, rows, cols):
    r, c = x.shape
    return jnp.pad(x, ((0, rows - r), (0, cols - c)))


# ----------------------------- graph / glue helpers -------------------------

def add_inverse_and_self(triples, num_nodes, num_rels):
    """[triples ; (o, r+nrel, s) ; (i, 2*nrel, i)] — same order as torch_rgcn."""
    s, r, o = triples[:, 0], triples[:, 1], triples[:, 2]
    inverse = jnp.stack([o, r + num_rels, s], axis=1)
    nodes = jnp.arange(num_nodes, dtype=triples.dtype)
    self_loops = jnp.stack([nodes, jnp.full_like(nodes, 2 * num_rels), nodes], axis=1)
    return jnp.concatenate([triples, inverse, self_loops], axis=0)


def stack_indices(triples_plus, num_nodes, num_relations, vertical):
    s, r, o = triples_plus[:, 0], triples_plus[:, 1], triples_plus[:, 2]
    if vertical:
        fr = r * num_nodes + s
        to = o
        size = (num_relations * num_nodes, num_nodes)
    else:
        fr = s
        to = r * num_nodes + o
        size = (num_nodes, num_relations * num_nodes)
    return fr, to, size


def sum_sparse(fr, to, size, row_normalisation):
    """torch_rgcn.utils.sum_sparse with all-ones values."""
    if not row_normalisation:
        fr, to = to, fr
        size = (size[1], size[0])
    row_sums = jnp.zeros((size[0],), jnp.float32).at[fr].add(1.0)
    return row_sums[fr]


def normalized_vals(triples_plus, num_nodes, num_relations, vertical,
                    general_edge_count, self_edge_count):
    fr, to, size = stack_indices(triples_plus, num_nodes, num_relations, vertical)
    sums = sum_sparse(fr, to, size, row_normalisation=vertical)
    if not vertical:
        # transpose-trick re-ordering from torch_rgcn (horizontal stacking)
        n, i = general_edge_count, self_edge_count
        sums = jnp.concatenate([sums[n:2 * n], sums[:n], sums[-i:]], axis=0)
    vals = 1.0 / sums
    return fr, to, size, vals


# ----------------------------- padded operand construction ------------------

def graph_dims(nnodes, nrel, nhid, nclass):
    R = 2 * nrel + 1
    K = R * nnodes
    tm = min(512, _round_up(nnodes, 8))          # row tile    (parallel axis)
    tk = min(1024, _round_up(K, 128))            # K tile      (reduction axis)
    return dict(R=R, K=K, tm=tm, tk=tk,
                n_pad=_round_up(nnodes, tm), k_pad=_round_up(K, tk),
                h_pad=_round_up(nhid, 128), c_pad=_round_up(nclass, 128))


def prepare_graph(triples, nnodes, nrel, nhid, nclass, params,
                  compute_dtype=jnp.bfloat16):
    """Dense, zero-padded operands for both layers (scatter-add adjacency).

    Both layers share the same (N, R*N) "block-column" layout: one entry at
    (s, r*N + o) per edge.  Layer 1 carries the horizontal-stacking
    ("transpose trick") normalisation; layer 2 (after reassociation) carries
    the vertical-stacking row normalisation scattered into the same layout.
    """
    d = graph_dims(nnodes, nrel, nhid, nclass)
    E = triples.shape[0]
    tp = add_inverse_and_self(triples, nnodes, nrel)

    fr, to, _, vals_h = normalized_vals(tp, nnodes, d["R"], vertical=False,
                                        general_edge_count=E, self_edge_count=nnodes)
    _, _, _, vals_v = normalized_vals(tp, nnodes, d["R"], vertical=True,
                                      general_edge_count=E, self_edge_count=nnodes)

    adj1 = (jnp.zeros((d["n_pad"], d["k_pad"]), jnp.float32)
            .at[fr, to].add(vals_h).astype(compute_dtype))
    adj2 = (jnp.zeros((d["n_pad"], d["k_pad"]), jnp.float32)
            .at[fr, to].add(vals_v).astype(compute_dtype))

    w1 = _pad2d(params["w1"].reshape(d["K"], nhid).astype(jnp.float32),
                d["k_pad"], d["h_pad"]).astype(compute_dtype)
    b1 = _pad2d(params["b1"][None, :].astype(jnp.float32), 1, d["h_pad"])
    b2 = _pad2d(params["b2"][None, :].astype(jnp.float32), 1, d["c_pad"])
    return dict(adj1=adj1, adj2=adj2, w1=w1, b1=b1, b2=b2, dims=d)


def make_hw(h_padded, nnodes, nhid, nclass, w2, dims, compute_dtype=jnp.bfloat16):
    """HW_flat[r*N + j, c] = sum_i h[j, i] * W2[r, i, c]  (tiny; plain JAX)."""
    h = h_padded[:nnodes, :nhid].astype(jnp.float32)
    hw = jnp.einsum("nh,rhc->rnc", h, w2.astype(jnp.float32),
                    precision=jax.lax.Precision.HIGHEST)
    hw = hw.reshape(dims["K"], nclass)
    return _pad2d(hw, dims["k_pad"], dims["c_pad"]).astype(compute_dtype)


# ----------------------------- Pallas kernel ---------------------------------

def _matmul_bias_kernel(a_ref, w_ref, b_ref, out_ref, acc_ref, *, apply_relu):
    """One (tm, tk) x (tk, c_pad) MXU step of A @ W + b, optional fused ReLU."""
    k = pl.program_id(1)

    @pl.when(k == 0)
    def _():
        acc_ref[...] = jnp.zeros_like(acc_ref)

    acc_ref[...] += jnp.dot(a_ref[...], w_ref[...],
                            preferred_element_type=jnp.float32)

    @pl.when(k == pl.num_programs(1) - 1)
    def _():
        y = acc_ref[...] + b_ref[...]
        if apply_relu:
            y = jnp.maximum(y, 0.0)
        out_ref[...] = y.astype(out_ref.dtype)


def matmul_bias(a, w, b, *, apply_relu, out_dtype, tm, tk):
    """Tiled, pipelined  out = [relu](a @ w + b)  with an f32 VMEM accumulator."""
    n_pad, k_pad = a.shape
    c_pad = w.shape[1]
    grid = (n_pad // tm, k_pad // tk)
    kernel = functools.partial(_matmul_bias_kernel, apply_relu=apply_relu)
    return pl.pallas_call(
        kernel,
        out_shape=jax.ShapeDtypeStruct((n_pad, c_pad), out_dtype),
        grid_spec=pltpu.PrefetchScalarGridSpec(
            num_scalar_prefetch=0,
            grid=grid,
            in_specs=[
                pl.BlockSpec((tm, tk), lambda i, k: (i, k)),
                pl.BlockSpec((tk, c_pad), lambda i, k: (k, 0)),
                pl.BlockSpec((1, c_pad), lambda i, k: (0, 0)),
            ],
            out_specs=pl.BlockSpec((tm, c_pad), lambda i, k: (i, 0)),
            scratch_shapes=[pltpu.VMEM((tm, c_pad), jnp.float32)],
        ),
        compiler_params=pltpu.CompilerParams(
            # row axis "parallel" -> megacore / 2-TC sharding on v7x;
            # K axis is the resident-accumulator reduction -> "arbitrary".
            dimension_semantics=("parallel", "arbitrary"),
            # explicit budget; tiles are sized to a few MiB double-buffered,
            # safe on v5e (16 MiB scoped default) and v7x (64 MiB physical).
            vmem_limit_bytes=32 * 1024 * 1024,
        ),
    )(a, w, b)


# ----------------------------- full model ------------------------------------

def node_classifier_forward(triples, nnodes, nrel, nhid, nclass, params,
                            compute_dtype=jnp.bfloat16):
    """NodeClassifier.forward() (nlayers=2, nfeat=None -> featureless)."""
    g = prepare_graph(triples, nnodes, nrel, nhid, nclass, params, compute_dtype)
    d = g["dims"]
    # layer 1 (horizontal stacking, featureless) + fused ReLU
    h = matmul_bias(g["adj1"], g["w1"], g["b1"], apply_relu=True,
                    out_dtype=compute_dtype, tm=d["tm"], tk=d["tk"])
    # layer 2 (vertical stacking), reassociated:  A_flat @ [h @ W2[r]]_r + b2
    hw = make_hw(h, nnodes, nhid, nclass, params["w2"], d, compute_dtype)
    out = matmul_bias(g["adj2"], hw, g["b2"], apply_relu=False,
                      out_dtype=jnp.float32, tm=d["tm"], tk=d["tk"])
    return out[:nnodes, :nclass]


# ----------------------------- references ------------------------------------

def node_classifier_reference(triples, nnodes, nrel, nhid, nclass, params):
    """Pure-f32 reference mirroring the torch code path (host matmuls)."""
    R = 2 * nrel + 1
    tp = add_inverse_and_self(triples, nnodes, nrel)
    E = triples.shape[0]

    fr, to, size, vals = normalized_vals(tp, nnodes, R, False, E, nnodes)
    adj_h = np.zeros(size, np.float32)
    np.add.at(adj_h, (np.asarray(fr), np.asarray(to)),
              np.asarray(vals).astype(np.float32))
    w1 = np.asarray(params["w1"]).astype(np.float32).reshape(R * nnodes, nhid)
    h = np.maximum(adj_h @ w1 + np.asarray(params["b1"]).astype(np.float32),
                   np.float32(0.0))

    fr, to, size, vals = normalized_vals(tp, nnodes, R, True, E, nnodes)
    adj_v = np.zeros(size, np.float32)
    np.add.at(adj_v, (np.asarray(fr), np.asarray(to)),
              np.asarray(vals).astype(np.float32))
    af = (adj_v @ h).reshape(R, nnodes, nhid)
    out = np.einsum("rio,rni->no", np.asarray(params["w2"]).astype(np.float32), af)
    return out + np.asarray(params["b2"]).astype(np.float32)


def node_classifier_host_mirror(triples, nnodes, nrel, nhid, nclass, params,
                                compute_dtype=jnp.bfloat16):
    """Same quantisation / layout as the Pallas path, host f32 matmuls —
    isolates Pallas-kernel correctness from the intentional bf16 quantisation."""
    g = prepare_graph(triples, nnodes, nrel, nhid, nclass, params, compute_dtype)
    d = g["dims"]
    a1 = np.asarray(g["adj1"]).astype(np.float32)
    w1 = np.asarray(g["w1"]).astype(np.float32)
    h = np.maximum(a1 @ w1 + np.asarray(g["b1"]).astype(np.float32), np.float32(0.0))
    h = jnp.asarray(h).astype(compute_dtype)            # mirror kernel output rounding
    hw = make_hw(h, nnodes, nhid, nclass, params["w2"], d, compute_dtype)
    a2 = np.asarray(g["adj2"]).astype(np.float32)
    out = a2 @ np.asarray(hw).astype(np.float32) + np.asarray(g["b2"]).astype(np.float32)
    return out[:nnodes, :nclass]


# ----------------------------- main ------------------------------------------

if __name__ == "__main__":
    # small synthetic graph: 16 nodes, 3 relations, 40 triples
    NNODES, NREL, NHID, NCLASS, E = 16, 3, 16, 4, 40
    R = 2 * NREL + 1

    key = jax.random.PRNGKey(0)
    k_s, k_r, k_o, k_w1, k_b1, k_w2, k_b2 = jax.random.split(key, 7)

    triples = jnp.stack([
        jax.random.randint(k_s, (E,), 0, NNODES),
        jax.random.randint(k_r, (E,), 0, NREL),
        jax.random.randint(k_o, (E,), 0, NNODES),
    ], axis=1).astype(jnp.int32)

    params = {
        # featureless layer-1 weights: (num_relations, num_nodes, nhid)
        "w1": 0.05 * jax.random.normal(k_w1, (R, NNODES, NHID), jnp.float32),
        "b1": 0.05 * jax.random.normal(k_b1, (NHID,), jnp.float32),
        # layer-2 weights: (num_relations, nhid, nclass)
        "w2": 0.05 * jax.random.normal(k_w2, (R, NHID, NCLASS), jnp.float32),
        "b2": 0.05 * jax.random.normal(k_b2, (NCLASS,), jnp.float32),
    }

    out = node_classifier_forward(triples, NNODES, NREL, NHID, NCLASS, params)
    out = jax.block_until_ready(out)
    assert out.shape == (NNODES, NCLASS)
    out_np = np.asarray(out).astype(np.float32)

    # (1) Pallas kernels vs an exact host mirror of the same quantised math
    #     (tight: only f32 accumulation-order noise differs).
    mirror = node_classifier_host_mirror(triples, NNODES, NREL, NHID, NCLASS, params)
    np.testing.assert_allclose(out_np, mirror, rtol=1e-2, atol=1e-3)

    # (2) Full forward vs the torch-mirroring f32 reference; tolerance covers
    #     the intentional bf16 quantisation of the adjacency / weight streams.
    ref = node_classifier_reference(triples, NNODES, NREL, NHID, NCLASS, params)
    np.testing.assert_allclose(out_np, ref, rtol=1e-1, atol=1e-2)

    print("KERNEL_OK")
</pallas_src>

<mosaic_0001>
module attributes {stable_mosaic.version = 11 : i64} {
  func.func @_matmul_bias_kernel(%arg0: i32, %arg1: i32, %arg2: memref<16x128xbf16, #tpu.memory_space<vmem>>, %arg3: memref<128x128xbf16, #tpu.memory_space<vmem>>, %arg4: memref<1x128xf32, #tpu.memory_space<vmem>>, %arg5: memref<16x128xbf16, #tpu.memory_space<vmem>>, %arg6: memref<16x128xf32, #tpu.memory_space<vmem>>) attributes {dimension_semantics = [#tpu.dimension_semantics<parallel>, #tpu.dimension_semantics<arbitrary>], iteration_bounds = array<i64: 1, 1>, scalar_prefetch = 0 : i64, scratch_operands = 1 : i64, tpu.core_type = #tpu.core_type<tc>, window_params = [{transform_indices = @transform_0, window_bounds = array<i64: 16, 128>}, {transform_indices = @transform_1, window_bounds = array<i64: 128, 128>}, {pipeline_mode = #tpu.pipeline_mode<synchronous>, transform_indices = @transform_2, window_bounds = array<i64: 1, 128>}, {transform_indices = @transform_3, window_bounds = array<i64: 16, 128>}]} {
    %c0_i32 = arith.constant 0 : i32
    %0 = arith.cmpi eq, %arg1, %c0_i32 : i32
    %1 = arith.extui %0 : i1 to i32
    %c0_i32_0 = arith.constant 0 : i32
    %2 = arith.cmpi ne, %1, %c0_i32_0 : i32
    scf.if %2 {
      %cst_10 = arith.constant 0.000000e+00 : f32
      %12 = vector.broadcast %cst_10 : f32 to vector<16x128xf32>
      %c0_11 = arith.constant 0 : index
      %c0_12 = arith.constant 0 : index
      %13 = vector.load %arg6[%c0_11, %c0_12] : memref<16x128xf32, #tpu.memory_space<vmem>>, vector<16x128xf32>
      tpu.vector_store %arg6[%c0_11, %c0_12], %12 {strides = array<i32>} : memref<16x128xf32, #tpu.memory_space<vmem>>, vector<16x128xf32>,
    } else {
    }
    %c0 = arith.constant 0 : index
    %c0_1 = arith.constant 0 : index
    %3 = vector.load %arg6[%c0, %c0_1] : memref<16x128xf32, #tpu.memory_space<vmem>>, vector<16x128xf32>
    %c0_2 = arith.constant 0 : index
    %c0_3 = arith.constant 0 : index
    %4 = vector.load %arg2[%c0_2, %c0_3] : memref<16x128xbf16, #tpu.memory_space<vmem>>, vector<16x128xbf16>
    %c0_4 = arith.constant 0 : index
    %c0_5 = arith.constant 0 : index
    %5 = vector.load %arg3[%c0_4, %c0_5] : memref<128x128xbf16, #tpu.memory_space<vmem>>, vector<128x128xbf16>
    %cst = arith.constant dense<0.000000e+00> : vector<16x128xf32>
    %6 = tpu.matmul %4, %5, %cst {dimension_numbers = #tpu.dot_dimension_numbers<[1], [0], [0], [1], [0, 0, 1, 1], [], []>} : vector<16x128xbf16>, vector<128x128xbf16>, vector<16x128xf32> -> vector<16x128xf32>
    %7 = arith.addf %3, %6 : vector<16x128xf32>
    %c0_6 = arith.constant 0 : index
    %c0_7 = arith.constant 0 : index
    %8 = vector.load %arg6[%c0_6, %c0_7] : memref<16x128xf32, #tpu.memory_space<vmem>>, vector<16x128xf32>
    tpu.vector_store %arg6[%c0_6, %c0_7], %7 {strides = array<i32>} : memref<16x128xf32, #tpu.memory_space<vmem>>, vector<16x128xf32>,
    %c0_i32_8 = arith.constant 0 : i32
    %9 = arith.cmpi eq, %arg1, %c0_i32_8 : i32
    %10 = arith.extui %9 : i1 to i32
    %c0_i32_9 = arith.constant 0 : i32
    %11 = arith.cmpi ne, %10, %c0_i32_9 : i32
    scf.if %11 {
      %c0_10 = arith.constant 0 : index
      %c0_11 = arith.constant 0 : index
      %12 = vector.load %arg6[%c0_10, %c0_11] : memref<16x128xf32, #tpu.memory_space<vmem>>, vector<16x128xf32>
      %c0_12 = arith.constant 0 : index
      %c0_13 = arith.constant 0 : index
      %13 = vector.load %arg4[%c0_12, %c0_13] : memref<1x128xf32, #tpu.memory_space<vmem>>, vector<1x128xf32>
      %14 = vector.broadcast %13 : vector<1x128xf32> to vector<16x128xf32>
      %15 = arith.addf %12, %14 : vector<16x128xf32>
      %cst_14 = arith.constant 0.000000e+00 : f32
      %16 = vector.broadcast %cst_14 : f32 to vector<16x128xf32>
      %17 = arith.maximumf %15, %16 : vector<16x128xf32>
      %18 = arith.truncf %17 : vector<16x128xf32> to vector<16x128xbf16>
      %c0_15 = arith.constant 0 : index
      %c0_16 = arith.constant 0 : index
      %19 = vector.load %arg5[%c0_15, %c0_16] : memref<16x128xbf16, #tpu.memory_space<vmem>>, vector<16x128xbf16>
      tpu.vector_store %arg5[%c0_15, %c0_16], %18 {strides = array<i32>} : memref<16x128xbf16, #tpu.memory_space<vmem>>, vector<16x128xbf16>,
    } else {
    }
    return
  }
  func.func @transform_0(%arg0: i32, %arg1: i32) -> (i32, i32) {
    %c0_i32 = arith.constant 0 : i32
    return %arg0, %arg1 : i32, i32
  }
  func.func @transform_1(%arg0: i32, %arg1: i32) -> (i32, i32) {
    %c0_i32 = arith.constant 0 : i32
    %c0_i32_0 = arith.constant 0 : i32
    return %arg1, %c0_i32 : i32, i32
  }
  func.func @transform_2(%arg0: i32, %arg1: i32) -> (i32, i32) {
    %c0_i32 = arith.constant 0 : i32
    %c0_i32_0 = arith.constant 0 : i32
    %c0_i32_1 = arith.constant 0 : i32
    return %c0_i32, %c0_i32_0 : i32, i32
  }
  func.func @transform_3(%arg0: i32, %arg1: i32) -> (i32, i32) {
    %c0_i32 = arith.constant 0 : i32
    %c0_i32_0 = arith.constant 0 : i32
    return %arg0, %c0_i32 : i32, i32
  }
}

</mosaic_0001>

<bundles_post_ra>
// kernel: tpu_custom_call.1
= control target key start
LH: loop header
LB: loop body
LE: loop exit
PB: predicated region body
PF: predicated region fallthrough
CT: control target
= control target key end

     0   :  { %8 = vsyncpa [#allocation4], 0  ;;  %s391_s0 = inlined_call_operand.hbm [shape: bf16[16,128], index: 0, kind: input, shape index: {}]   ;;  %s392_s1 = inlined_call_operand.hbm [shape: bf16[128,128], index: 1, kind: input, shape index: {}]   ;;  %s393_s2 = inlined_call_operand.vmem [shape: f32[1,128], index: 2, kind: input, shape index: {}]   ;;  %s394_s3 = inlined_call_operand.hbm [shape: bf16[16,128], index: 3, kind: output, shape index: {}]  }
   0x1   :  { %9 = vsyncpa [#allocation7], 0 }
   0x2   :  { %10 = vsyncpa [#allocation5], 0  ;;  %s343_s12 = smov [#allocation3]  }
   0x3   :  { %s16_s13 = sshll.u32 %s343_s12, 4  ;;  %s17_s13 = int_to_ptr.vmem [resolvable:$true] %s16_s13 }
   0x4   :  { %s285_s14 = scalar_lea.vmem %s17_s13, 128  ;;  %p290_p1 = scmp.lt.s32.totalorder %s17_s13, %s17_s13 }
   0x5   :  { %p286_p0 = scmp.ne.s32.totalorder %s17_s13, %s285_s14  ;;  %p291_p2 = scmp.lt.s32.totalorder %s285_s14, %s285_s14 }
   0x7   :  { %p292_p3 = por %p291_p2, %p290_p1 }
   0x9   :  { %p293_p4 = pnand %p292_p3, %p286_p0 }
   0xb   :  { %296 = shalt.err (!%p293_p4)
}
   0xc   :  { %s344_s15 = smov 64   ;;  %s345_s16 = smov 4  }
   0xd   :  { %22 = dma.hbm_to_vmem [thread:$0]  %s391_s0, 128, %s17_s13, [#allocation4], %s344_s15, %s344_s15, %s345_s16  }
   0xe   :  { %s346_s19 = smov [#allocation6]  }
   0xf   :  { %s28_s20 = sshll.u32 %s346_s19, 4  ;;  %s29_s20 = int_to_ptr.vmem [resolvable:$true] %s28_s20 }
  0x10   :  { %s305_s21 = scalar_lea.vmem %s29_s20, 1024  ;;  %p310_p6 = scmp.lt.s32.totalorder %s29_s20, %s29_s20 }
  0x11   :  { %p306_p5 = scmp.ne.s32.totalorder %s29_s20, %s305_s21  ;;  %p311_p7 = scmp.lt.s32.totalorder %s305_s21, %s305_s21 }
  0x13   :  { %p312_p8 = por %p311_p7, %p310_p6 }
  0x15   :  { %p313_p9 = pnand %p312_p8, %p306_p5 }
  0x17   :  { %316 = shalt.err (!%p313_p9)
}
  0x18   :  { %34 = dma.hbm_to_vmem [thread:$0]  %s392_s1, 1024, %s29_s20, [#allocation7], %s344_s15, %s344_s15, %s345_s16  }
  0x19   :  { %337 = dma.done.wait [#allocation4], 128  }
  0x1a   :  { %338 = vsyncadd [#allocation4], 4294967168 }
  0x1b   :  { %339 = dma.done.wait [#allocation7], 1024  }
  0x1c   :  { %340 = vsyncadd [#allocation7], 4294966272  ;;  %v347_v0 = vmov 0.0   ;;  %vm348_vm0 = vmmov 0   ;;  %v268_v1 = vld [vmem:[#allocation6 + $0x38] sm:$0xff]   ;;  %v269_v2 = vld [vmem:[#allocation6 + $0x30] sm:$0xff]  }
  0x1d   :  { %241 = vmatprep.subr.bf16.mxu0 %v347_v0  ;;  %257 = vmatprep.mubr.msk.bf16.mxu0 %vm348_vm0, %v347_v0  ;;  %v270_v3 = vld [vmem:[#allocation6 + $0x28] sm:$0xff]   ;;  %v271_v4 = vld [vmem:[#allocation6 + $0x20] sm:$0xff]   ;;  %v272_v5 = vld [vmem:[#allocation6 + $0x18] sm:$0xff]   ;;  %s349_s24 = smov [#allocation8]  }
  0x1e   :  { %242 = vmatpush3.bf16.msra.mxu0 %v268_v1  ;;  %v273_v6 = vld [vmem:[#allocation6 + $0x10] sm:$0xff]   ;;  %v274_v7 = vld [vmem:[#allocation6 + $0x8] sm:$0xff]   ;;  %v275_v8 = vld [vmem:[#allocation6] sm:$0xff]   ;;  %s200_s25 = sshll.u32 %s349_s24, 4  ;;  %s201_s25 = int_to_ptr.vmem [resolvable:$true] %s200_s25 }
  0x1f   :  { %243 = vmatprep.subr.bf16.mxu0 %v347_v0  ;;  %v276_v9 = vld [vmem:[#allocation3] sm:$0xff]   ;;  %s317_s26 = scalar_lea.vmem %s201_s25, 128  ;;  %p322_p11 = scmp.lt.s32.totalorder %s201_s25, %s201_s25 }
  0x20   :  { %v222_v11 = vld [vmem:[%s393_s2] ss:$0 sm:$0xff]  ;;  %p318_p10 = scmp.ne.s32.totalorder %s201_s25, %s317_s26  ;;  %p323_p12 = scmp.lt.s32.totalorder %s317_s26, %s317_s26 }
  0x22   :  { %244 = vmatpush3.bf16.msra.mxu0 %v269_v2  ;;  %p324_p13 = por %p323_p12, %p322_p11 }
  0x23   :  { %245 = vmatprep.subr.bf16.mxu0 %v347_v0 }
  0x24   :  { %p325_p0 = pnand %p324_p13, %p318_p10 }
  0x26   :  { %246 = vmatpush3.bf16.msra.mxu0 %v270_v3 }
  0x27   :  { %247 = vmatprep.subr.bf16.mxu0 %v347_v0 }
  0x2a   :  { %248 = vmatpush3.bf16.msra.mxu0 %v271_v4 }
  0x2b   :  { %249 = vmatprep.subr.bf16.mxu0 %v347_v0 }
  0x2e   :  { %250 = vmatpush3.bf16.msra.mxu0 %v272_v5 }
  0x2f   :  { %251 = vmatprep.subr.bf16.mxu0 %v347_v0 }
  0x32   :  { %252 = vmatpush3.bf16.msra.mxu0 %v273_v6 }
  0x33   :  { %253 = vmatprep.subr.bf16.mxu0 %v347_v0 }
  0x36   :  { %254 = vmatpush3.bf16.msra.mxu0 %v274_v7 }
  0x37   :  { %255 = vmatprep.subr.bf16.mxu0 %v347_v0 }
  0x3a   :  { %256 = vmatpush3.bf16.msra.mxu0 %v275_v8 }
  0x3d   :  { %258 = vmatmul.mubr.bf16.vlgmr.msra.gmra.mxu0 %v276_v9 }
  0xfd   :  { %v158_v10 = vpop.f32.mrf.mxu0 }
  0xfe   :  { %v181_v13 = vadd.f32 %v222_v11, %v158_v10 }
  0xff   :  { %v259_v12 = vpop.f32.mrf.mxu0 }
 0x100   :  { %v183_v17 = vmax.f32 %v181_v13, 0.0 }
 0x101   :  { %v161_v14 = vpop.f32.mrf.mxu0 }
 0x102   :  { %v182_v15 = vadd.f32 %v222_v11, %v161_v14 }
 0x103   :  { %v260_v16 = vpop.f32.mrf.mxu0 }
 0x104   :  { %v184_v18 = vmax.f32 %v182_v15, 0.0 }
 0x106   :  { %v230_v19 = vpack.c.bf16 %v184_v18, %v183_v17 }
 0x108   :  { %231 = vst [vmem:[#allocation8] sm:$0xff] %v230_v19  }
 0x109   :  { %328 = shalt.err (!%p325_p0)
}
 0x10a   :  { %206 = dma.vmem_to_hbm [thread:$0]  %s201_s25, 128, %s394_s3, [#allocation5], %s344_s15, %s344_s15, %s345_s16  }
 0x10b   :  { %341 = dma.done.wait [#allocation5], 128  }
 0x10c   :  { %342 = vsyncadd [#allocation5], 4294967168 }
 0x10d   :  { %210 = vsyncpa [#allocation4], 1 }
 0x10e   :  { %211 = vsyncpa [#allocation7], 1 }
 0x10f   :  { %212 = vsyncpa [#allocation5], 1 }

</bundles_post_ra>
